<compile_context>
chip_gen: v6e
topology: v6e:2x2x1
jax: 0.10.0
libtpu: 0.0.40
codegen_flags: <defaults>
</compile_context>

<pallas_src>
import functools

import jax
import jax.numpy as jnp
from jax.experimental import pallas as pl
from jax.experimental.pallas import tpu as pltpu


def _round_up(x, m):
    return ((x + m - 1) // m) * m


def _attr_loss_kernel(attr_ref, logits_ref, out_ref, *, n_rows):
    attrs = attr_ref[...]            # (TN, K) int32
    logits = logits_ref[...]         # (TN, C) float32
    tn, k = attrs.shape
    c = logits.shape[1]

    # ---- zero the running-sum output on the first grid step ------------------
    @pl.when(pl.program_id(0) == 0)
    def _():
        out_ref[...] = jnp.zeros_like(out_ref)

    # ---- presence of each class id among the row's nonzero attribute slots ---
    # (boolean OR chain, K is small & static; duplicates collapse exactly like
    #  the torch scatter-assign; class id 0 is the padding value -> never a target)
    class_ids = jax.lax.broadcasted_iota(jnp.int32, (tn, c), 1)       # (TN, C)
    pres = attrs[:, 0:1] == class_ids
    for j in range(1, k):
        pres = pres | (attrs[:, j:j + 1] == class_ids)
    masked = pres & (class_ids > 0)                                   # (TN, C) bool
    # NOTE: an int16 compare chain (attrs/class_ids) could halve the VALU cost of
    # this loop on v6e/v7x via sublane packing; kept int32 pending bundle-dump proof.

    # number of nonzero attribute slots (soft-target denominator); exact divide
    count = jnp.sum(jnp.where(attrs != 0, 1.0, 0.0), axis=1, keepdims=True)   # (TN, 1)
    inv_count = jnp.where(count > 0.0, 1.0 / count, 0.0)                      # (TN, 1)

    # ---- fused soft cross-entropy (log_softmax never materialized) -----------
    m = jnp.max(logits, axis=1, keepdims=True)                                # (TN, 1)
    shifted = logits - m                                                      # (TN, C)
    lse = jnp.log(jnp.sum(jnp.exp(shifted), axis=1, keepdims=True))           # (TN, 1)
    # sum_c(-sim * log_softmax) = inv_count * sum_{c present}(lse - shifted[c])
    per_row = inv_count * jnp.sum(jnp.where(masked, lse - shifted, 0.0),
                                  axis=1, keepdims=True)                      # (TN, 1)

    # ---- mask ragged last-tile rows (select 0; never multiply, NaN-safe) -----
    row_ids = pl.program_id(0) * tn + jax.lax.broadcasted_iota(jnp.int32, (tn, 1), 0)
    per_row = jnp.where(row_ids < n_rows, per_row, 0.0)

    # ---- fold this tile into the resident scalar accumulator -----------------
    out_ref[...] += jnp.sum(per_row, axis=0, keepdims=True)                   # (1, 1)


def attribute_rcnn_loss(attributes, attribute_logits, loss_weight=0.5, tile_n=1024):
    """Row-tiled Pallas call; the kernel returns sum_i per_row[i] as a (1,1) scalar."""
    N, K = attributes.shape
    _, C = attribute_logits.shape
    if N == 0:
        # No proposals -> no loss (guards the divide-by-zero in the mean).
        return jnp.float32(0.0)

    # Row tile: multiple of 8 (sublane), as large as reasonable (amortizes per-step
    # overhead), clamped so a single tile covers small N.  No wrapper-side padding.
    tile_n = max(8, min(int(tile_n), _round_up(N, 8)))
    tile_n = _round_up(tile_n, 8)
    grid_n = pl.cdiv(N, tile_n)

    total = pl.pallas_call(
        functools.partial(_attr_loss_kernel, n_rows=N),
        out_shape=jax.ShapeDtypeStruct((1, 1), jnp.float32),
        grid=(grid_n,),
        in_specs=[
            pl.BlockSpec((tile_n, K), lambda i: (i, 0)),   # attributes tile
            pl.BlockSpec((tile_n, C), lambda i: (i, 0)),   # logits tile
        ],
        # Same (1,1) block for every grid step -> resident accumulator (P3).
        out_specs=pl.BlockSpec((1, 1), lambda i: (0, 0)),
        compiler_params=pltpu.CompilerParams(
            dimension_semantics=("arbitrary",),            # accumulator axis is serial
        ),
    )(attributes, attribute_logits)

    # Scalar epilogue only: mean over the REAL N and the cfg loss weight.
    return loss_weight * (total[0, 0] / N)


def _reference_loss(attributes, attribute_logits, loss_weight=0.5):
    """Pure-JAX reference mirroring the PyTorch forward."""
    C = attribute_logits.shape[1]
    nonzero = attributes != 0
    count = jnp.sum(nonzero, axis=1, keepdims=True).astype(jnp.float32)
    hit = (attributes[:, :, None] == jnp.arange(C)[None, None, :]) & nonzero[:, :, None]
    presence = jnp.any(hit, axis=1).astype(jnp.float32)
    sim = jnp.where(count > 0, presence / jnp.maximum(count, 1.0), 0.0)
    log_softmax = jax.nn.log_softmax(attribute_logits, axis=1)
    return loss_weight * jnp.mean(jnp.sum(-sim * log_softmax, axis=1))


if __name__ == "__main__":
    K, C = 8, 128
    LOSS_WEIGHT = 0.5  # cfg.MODEL.ROI_ATTRIBUTE_HEAD.LOSS_WEIGHT
    keys = jax.random.split(jax.random.PRNGKey(0), 6)

    # --- case 1: small single-tile config --------------------------------------
    N = 16
    attribute_logits = jax.random.normal(keys[0], (N, C), dtype=jnp.float32)
    raw_ids = jax.random.randint(keys[1], (N, K), 1, C, dtype=jnp.int32)
    keep = jax.random.bernoulli(keys[2], p=0.4, shape=(N, K))
    attributes = jnp.where(keep, raw_ids, 0).astype(jnp.int32)

    loss = attribute_rcnn_loss(attributes, attribute_logits, LOSS_WEIGHT)
    loss = jax.block_until_ready(loss)
    ref = _reference_loss(attributes, attribute_logits, LOSS_WEIGHT)
    assert jnp.allclose(loss, ref, rtol=1e-5, atol=1e-5), (loss, ref)

    # --- case 2: multi-tile accumulator + ragged last tile (no padding) --------
    N2 = 52  # not a multiple of tile_n -> last block has only 4 valid rows
    logits2 = jax.random.normal(keys[3], (N2, C), dtype=jnp.float32)
    ids2 = jax.random.randint(keys[4], (N2, K), 1, C, dtype=jnp.int32)
    keep2 = jax.random.bernoulli(keys[5], p=0.3, shape=(N2, K))
    attrs2 = jnp.where(keep2, ids2, 0).astype(jnp.int32)

    loss2 = attribute_rcnn_loss(attrs2, logits2, LOSS_WEIGHT, tile_n=16)
    loss2 = jax.block_until_ready(loss2)
    ref2 = _reference_loss(attrs2, logits2, LOSS_WEIGHT)
    assert jnp.allclose(loss2, ref2, rtol=1e-5, atol=1e-5), (loss2, ref2)

    print("KERNEL_OK")
</pallas_src>

<mosaic_0001>
module attributes {stable_mosaic.version = 11 : i64} {
  func.func @_attr_loss_kernel(%arg0: i32, %arg1: memref<16x8xi32, #tpu.memory_space<vmem>>, %arg2: memref<16x128xf32, #tpu.memory_space<vmem>>, %arg3: memref<1x1xf32, #tpu.memory_space<vmem>>) attributes {dimension_semantics = [#tpu.dimension_semantics<arbitrary>], iteration_bounds = array<i64: 1>, scalar_prefetch = 0 : i64, scratch_operands = 0 : i64, tpu.core_type = #tpu.core_type<tc>, window_params = [{transform_indices = @transform_0, window_bounds = array<i64: 16, 8>}, {transform_indices = @transform_1, window_bounds = array<i64: 16, 128>}, {pipeline_mode = #tpu.pipeline_mode<synchronous>, transform_indices = @transform_2, window_bounds = array<i64: 1, 1>}]} {
    %c0 = arith.constant 0 : index
    %c0_0 = arith.constant 0 : index
    %0 = vector.load %arg1[%c0, %c0_0] : memref<16x8xi32, #tpu.memory_space<vmem>>, vector<16x8xi32>
    %c0_1 = arith.constant 0 : index
    %c0_2 = arith.constant 0 : index
    %1 = vector.load %arg2[%c0_1, %c0_2] : memref<16x128xf32, #tpu.memory_space<vmem>>, vector<16x128xf32>
    %c0_i32 = arith.constant 0 : i32
    %2 = arith.cmpi eq, %arg0, %c0_i32 : i32
    %3 = arith.extui %2 : i1 to i32
    %c0_i32_3 = arith.constant 0 : i32
    %4 = arith.cmpi ne, %3, %c0_i32_3 : i32
    scf.if %4 {
      %cst_22 = arith.constant 0.000000e+00 : f32
      %81 = vector.broadcast %cst_22 : f32 to vector<1x1xf32>
      %c0_23 = arith.constant 0 : index
      %c0_24 = arith.constant 0 : index
      %82 = vector.load %arg3[%c0_23, %c0_24] : memref<1x1xf32, #tpu.memory_space<vmem>>, vector<1x1xf32>
      tpu.vector_store %arg3[%c0_23, %c0_24], %81 {strides = array<i32>} : memref<1x1xf32, #tpu.memory_space<vmem>>, vector<1x1xf32>,
    } else {
    }
    %5 = tpu.iota {dimensions = array<i32: 1>} : vector<16x128xi32>
    %6 = vector.extract_strided_slice %0 {offsets = [0, 0], sizes = [16, 1], strides = [1, 1]} : vector<16x8xi32> to vector<16x1xi32>
    %7 = vector.broadcast %6 : vector<16x1xi32> to vector<16x128xi32>
    %8 = arith.cmpi eq, %7, %5 : vector<16x128xi32>
    %9 = vector.extract_strided_slice %0 {offsets = [0, 1], sizes = [16, 1], strides = [1, 1]} : vector<16x8xi32> to vector<16x1xi32>
    %10 = vector.broadcast %9 : vector<16x1xi32> to vector<16x128xi32>
    %11 = arith.cmpi eq, %10, %5 : vector<16x128xi32>
    %12 = arith.ori %8, %11 : vector<16x128xi1>
    %13 = vector.extract_strided_slice %0 {offsets = [0, 2], sizes = [16, 1], strides = [1, 1]} : vector<16x8xi32> to vector<16x1xi32>
    %14 = vector.broadcast %13 : vector<16x1xi32> to vector<16x128xi32>
    %15 = arith.cmpi eq, %14, %5 : vector<16x128xi32>
    %16 = arith.ori %12, %15 : vector<16x128xi1>
    %17 = vector.extract_strided_slice %0 {offsets = [0, 3], sizes = [16, 1], strides = [1, 1]} : vector<16x8xi32> to vector<16x1xi32>
    %18 = vector.broadcast %17 : vector<16x1xi32> to vector<16x128xi32>
    %19 = arith.cmpi eq, %18, %5 : vector<16x128xi32>
    %20 = arith.ori %16, %19 : vector<16x128xi1>
    %21 = vector.extract_strided_slice %0 {offsets = [0, 4], sizes = [16, 1], strides = [1, 1]} : vector<16x8xi32> to vector<16x1xi32>
    %22 = vector.broadcast %21 : vector<16x1xi32> to vector<16x128xi32>
    %23 = arith.cmpi eq, %22, %5 : vector<16x128xi32>
    %24 = arith.ori %20, %23 : vector<16x128xi1>
    %25 = vector.extract_strided_slice %0 {offsets = [0, 5], sizes = [16, 1], strides = [1, 1]} : vector<16x8xi32> to vector<16x1xi32>
    %26 = vector.broadcast %25 : vector<16x1xi32> to vector<16x128xi32>
    %27 = arith.cmpi eq, %26, %5 : vector<16x128xi32>
    %28 = arith.ori %24, %27 : vector<16x128xi1>
    %29 = vector.extract_strided_slice %0 {offsets = [0, 6], sizes = [16, 1], strides = [1, 1]} : vector<16x8xi32> to vector<16x1xi32>
    %30 = vector.broadcast %29 : vector<16x1xi32> to vector<16x128xi32>
    %31 = arith.cmpi eq, %30, %5 : vector<16x128xi32>
    %32 = arith.ori %28, %31 : vector<16x128xi1>
    %33 = vector.extract_strided_slice %0 {offsets = [0, 7], sizes = [16, 1], strides = [1, 1]} : vector<16x8xi32> to vector<16x1xi32>
    %34 = vector.broadcast %33 : vector<16x1xi32> to vector<16x128xi32>
    %35 = arith.cmpi eq, %34, %5 : vector<16x128xi32>
    %36 = arith.ori %32, %35 : vector<16x128xi1>
    %c0_i32_4 = arith.constant 0 : i32
    %37 = vector.broadcast %c0_i32_4 : i32 to vector<16x128xi32>
    %38 = arith.cmpi sgt, %5, %37 : vector<16x128xi32>
    %39 = arith.andi %36, %38 : vector<16x128xi1>
    %c0_i32_5 = arith.constant 0 : i32
    %40 = vector.broadcast %c0_i32_5 : i32 to vector<16x8xi32>
    %41 = arith.cmpi ne, %0, %40 : vector<16x8xi32>
    %cst = arith.constant 1.000000e+00 : f32
    %cst_6 = arith.constant 0.000000e+00 : f32
    %42 = vector.broadcast %cst : f32 to vector<16x8xf32>
    %43 = vector.broadcast %cst_6 : f32 to vector<16x8xf32>
    %44 = arith.select %41, %42, %43 : vector<16x8xi1>, vector<16x8xf32>
    %cst_7 = arith.constant dense<0.000000e+00> : vector<16xf32>
    %45 = vector.multi_reduction <add>, %44, %cst_7 [1] : vector<16x8xf32> to vector<16xf32>
    %46 = vector.shape_cast %45 : vector<16xf32> to vector<16x1xf32>
    %cst_8 = arith.constant 0.000000e+00 : f32
    %47 = vector.broadcast %cst_8 : f32 to vector<16x1xf32>
    %48 = arith.cmpf ogt, %46, %47 : vector<16x1xf32>
    %cst_9 = arith.constant 1.000000e+00 : f32
    %49 = vector.broadcast %cst_9 : f32 to vector<16x1xf32>
    %50 = arith.divf %49, %46 : vector<16x1xf32>
    %cst_10 = arith.constant 0.000000e+00 : f32
    %51 = vector.broadcast %cst_10 : f32 to vector<16x1xf32>
    %52 = arith.select %48, %50, %51 : vector<16x1xi1>, vector<16x1xf32>
    %cst_11 = arith.constant dense<0xFF800000> : vector<16xf32>
    %53 = vector.multi_reduction <maximumf>, %1, %cst_11 [1] : vector<16x128xf32> to vector<16xf32>
    %54 = vector.shape_cast %53 : vector<16xf32> to vector<16x1xf32>
    %55 = vector.broadcast %54 : vector<16x1xf32> to vector<16x128xf32>
    %56 = arith.subf %1, %55 : vector<16x128xf32>
    %57 = math.exp %56 : vector<16x128xf32>
    %cst_12 = arith.constant dense<0.000000e+00> : vector<16xf32>
    %58 = vector.multi_reduction <add>, %57, %cst_12 [1] : vector<16x128xf32> to vector<16xf32>
    %59 = vector.shape_cast %58 : vector<16xf32> to vector<16x1xf32>
    %60 = math.log %59 : vector<16x1xf32>
    %61 = vector.broadcast %60 : vector<16x1xf32> to vector<16x128xf32>
    %62 = arith.subf %61, %56 : vector<16x128xf32>
    %cst_13 = arith.constant 0.000000e+00 : f32
    %63 = vector.broadcast %cst_13 : f32 to vector<16x128xf32>
    %64 = arith.select %39, %62, %63 : vector<16x128xi1>, vector<16x128xf32>
    %cst_14 = arith.constant dense<0.000000e+00> : vector<16xf32>
    %65 = vector.multi_reduction <add>, %64, %cst_14 [1] : vector<16x128xf32> to vector<16xf32>
    %66 = vector.shape_cast %65 : vector<16xf32> to vector<16x1xf32>
    %67 = arith.mulf %52, %66 : vector<16x1xf32>
    %c16_i32 = arith.constant 16 : i32
    %68 = arith.muli %arg0, %c16_i32 : i32
    %69 = tpu.iota {dimensions = array<i32: 0>} : vector<16x1xi32>
    %70 = vector.broadcast %68 : i32 to vector<16x1xi32>
    %71 = arith.addi %70, %69 : vector<16x1xi32>
    %c16_i32_15 = arith.constant 16 : i32
    %72 = vector.broadcast %c16_i32_15 : i32 to vector<16x1xi32>
    %73 = arith.cmpi slt, %71, %72 : vector<16x1xi32>
    %cst_16 = arith.constant 0.000000e+00 : f32
    %74 = vector.broadcast %cst_16 : f32 to vector<16x1xf32>
    %75 = arith.select %73, %67, %74 : vector<16x1xi1>, vector<16x1xf32>
    %c0_17 = arith.constant 0 : index
    %c0_18 = arith.constant 0 : index
    %76 = vector.load %arg3[%c0_17, %c0_18] : memref<1x1xf32, #tpu.memory_space<vmem>>, vector<1x1xf32>
    %cst_19 = arith.constant dense<0.000000e+00> : vector<1xf32>
    %77 = vector.multi_reduction <add>, %75, %cst_19 [0] : vector<16x1xf32> to vector<1xf32>
    %78 = vector.shape_cast %77 : vector<1xf32> to vector<1x1xf32>
    %79 = arith.addf %76, %78 : vector<1x1xf32>
    %c0_20 = arith.constant 0 : index
    %c0_21 = arith.constant 0 : index
    %80 = vector.load %arg3[%c0_20, %c0_21] : memref<1x1xf32, #tpu.memory_space<vmem>>, vector<1x1xf32>
    tpu.vector_store %arg3[%c0_20, %c0_21], %79 {strides = array<i32>} : memref<1x1xf32, #tpu.memory_space<vmem>>, vector<1x1xf32>,
    return
  }
  func.func @transform_0(%arg0: i32) -> (i32, i32) {
    %c0_i32 = arith.constant 0 : i32
    %c0_i32_0 = arith.constant 0 : i32
    return %arg0, %c0_i32 : i32, i32
  }
  func.func @transform_1(%arg0: i32) -> (i32, i32) {
    %c0_i32 = arith.constant 0 : i32
    %c0_i32_0 = arith.constant 0 : i32
    return %arg0, %c0_i32 : i32, i32
  }
  func.func @transform_2(%arg0: i32) -> (i32, i32) {
    %c0_i32 = arith.constant 0 : i32
    %c0_i32_0 = arith.constant 0 : i32
    %c0_i32_1 = arith.constant 0 : i32
    return %c0_i32, %c0_i32_0 : i32, i32
  }
}

</mosaic_0001>

<bundles_post_ra>
// kernel: tpu_custom_call.1
= control target key start
LH: loop header
LB: loop body
LE: loop exit
PB: predicated region body
PF: predicated region fallthrough
CT: control target
= control target key end

     0   :  { %v244_v2 = vmov 0   ;;  %s299_s0 = inlined_call_operand.vmem [shape: s32[16,8], index: 0, kind: input, shape index: {}]   ;;  %s300_s1 = inlined_call_operand.vmem [shape: f32[16,128], index: 1, kind: input, shape index: {}]   ;;  %s301_s2 = inlined_call_operand.hbm [shape: f32[1,1], index: 2, kind: output, shape index: {}]  }
   0x1   :  { %v14_v0 = vld [vmem:[%s300_s1] sm:$0xff]  ;;  %v13_v1 = vld [vmem:[%s299_s0 + $0x8] sm:$0xff]  ;;  %199 = vset.pattern.permute.xlu1 %v244_v2  ;;  %198 = vset.pattern.permute.xlu0 %v244_v2 }
   0x2   :  { %124 = vmax.xlane.f32.xlu0 %v14_v0  ;;  %v15_v3 = vld [vmem:[%s300_s1 + $0x8] sm:$0xff]  ;;  %28 = vperm.xlu1 %199, %v13_v1  }
   0x3   :  { %7 = vsyncpa [#allocation3], 0  ;;  %v12_v4 = vld [vmem:[%s299_s0] sm:$0xff]  ;;  %v245_v5 = vmov 1   ;;  %v246_v6 = vmov 2   ;;  %v247_v7 = vmov 3   ;;  %v22_v34 = vlaneseq }
   0x4   :  { %v248_v8 = vmov 4   ;;  %v249_v9 = vmov 6   ;;  %v250_v10 = vmov 5   ;;  %v251_v11 = vmov 7   ;;  %s253_s0 = smov [#allocation2]  }
   0x5   :  { %vm106_vm0 = vcmp.ne.s32.totalorder %v13_v1, 0  ;;  %v252_v12 = vmov 0.0   ;;  %vm109_vm1 = vcmask 64512   ;;  %vm105_vm2 = vcmp.ne.s32.totalorder %v12_v4, 0  ;;  %s180_s1 = sshll.u32 %s253_s0, 4  ;;  %s181_s1 = int_to_ptr.vmem [resolvable:$true] %s180_s1 }
   0x6   :  { %126 = vmax.xlane.f32.xlu0 %v15_v3  ;;  %200 = vset.pattern.permute.xlu1 %v245_v5  ;;  %v108_v13 = vsel %vm106_vm0, 1.0, %v252_v12  ;;  %v107_v23 = vsel %vm105_vm2, 1.0, %v252_v12  ;;  %v23_v36 = vand.u32 127, %v22_v34  ;;  %s222_s17 = scalar_lea.vmem %s181_s1, 16  ;;  %s226_s18 = scalar_lea.vmem %s181_s1, 32 }
   0x7   :  { %33 = vperm.xlu1 %200, %v12_v4   ;;  %v113_v14 = vsel %vm109_vm1, %v108_v13, 0.0  ;;  %v110_v24 = vsel %vm109_vm1, %v107_v23, 0.0  ;;  %p223_p0 = scmp.ne.s32.totalorder %s181_s1, %s222_s17  ;;  %p227_p1 = scmp.lt.s32.totalorder %s181_s1, %s181_s1 }
   0x8   :  { %p228_p2 = scmp.lt.s32.totalorder %s226_s18, %s222_s17 }
   0xa   :  { %p229_p3 = por %p228_p2, %p227_p1 }
   0xb   :  { %36 = vperm.xlu1 %200, %v13_v1  }
   0xc   :  { %p230_p4 = pnand %p229_p3, %p223_p0 }
   0xf   :  { %201 = vset.pattern.permute.xlu1 %v246_v6 }
  0x10   :  { %43 = vperm.xlu1 %201, %v12_v4  }
  0x14   :  { %46 = vperm.xlu1 %201, %v13_v1  }
  0x18   :  { %202 = vset.pattern.permute.xlu1 %v247_v7 }
  0x19   :  { %53 = vperm.xlu1 %202, %v12_v4  }
  0x1c   :  { %25 = vperm.xlu0 %198, %v12_v4  }
  0x1d   :  { %56 = vperm.xlu1 %202, %v13_v1  }
  0x20   :  { %204 = vset.pattern.permute.xlu0 %v248_v8 }
  0x21   :  { %66 = vperm.xlu0 %204, %v13_v1   ;;  %203 = vset.pattern.permute.xlu1 %v248_v8 }
  0x22   :  { %63 = vperm.xlu1 %203, %v12_v4  }
  0x25   :  { %206 = vset.pattern.permute.xlu0 %v249_v9 }
  0x26   :  { %83 = vperm.xlu0 %206, %v12_v4   ;;  %205 = vset.pattern.permute.xlu1 %v250_v10 }
  0x27   :  { %73 = vperm.xlu1 %205, %v12_v4  }
  0x2a   :  { %209 = vset.pattern.permute.xlu0 %v251_v11 }
  0x2b   :  { %96 = vperm.xlu0 %209, %v13_v1   ;;  %76 = vperm.xlu1 %205, %v13_v1  }
  0x2f   :  { %207 = vset.pattern.permute.xlu1 %v249_v9 }
  0x30   :  { %86 = vperm.xlu1 %207, %v13_v1  }
  0x34   :  { %208 = vset.pattern.permute.xlu1 %v251_v11 }
  0x4a   :  { %114 = vadd.xlane.f32.xlu0 %v113_v14 }
  0x7d   :  { %v29_v25 = vpop.permute.xlu1 %28 }
  0x7e   :  { %vm31_vm5 = vcmp.eq.s32.totalorder %v29_v25, %v23_v36 }
  0x82   :  { %v34_v26 = vpop.permute.xlu1 %33 }
  0x83   :  { %vm38_vm3 = vcmp.eq.s32.totalorder %v34_v26, %v23_v36 }
  0x86   :  { %v37_v27 = vpop.permute.xlu1 %36 }
  0x87   :  { %vm39_vm6 = vcmp.eq.s32.totalorder %v37_v27, %v23_v36 }
  0x88   :  { %vm41_vm9 = vmor %vm31_vm5, %vm39_vm6 }
  0x8b   :  { %v125_v15 = vpop.xlane.xlu0 %124  ;;  %v44_v28 = vpop.permute.xlu1 %43 }
  0x8c   :  { %v283_v16 = vsub.f32 %v14_v0, %v125_v15  ;;  %vm48_vm7 = vcmp.eq.s32.totalorder %v44_v28, %v23_v36 }
  0x8e   :  { %v130_v17 = vmul.f32 1.442695, %v283_v16 }
  0x8f   :  { %v127_v18 = vpop.xlane.xlu0 %126  ;;  %v47_v29 = vpop.permute.xlu1 %46 }
  0x90   :  { %210 = vpow2.f32 %v130_v17  ;;  %v286_v19 = vsub.f32 %v15_v3, %v127_v18  ;;  %vm49_vm10 = vcmp.eq.s32.totalorder %v47_v29, %v23_v36 }
  0x91   :  { %vm51_vm13 = vmor %vm41_vm9, %vm49_vm10 }
  0x92   :  { %v132_v20 = vmul.f32 1.442695, %v286_v19 }
  0x94   :  { %212 = vpow2.f32 %v132_v20  ;;  %v54_v30 = vpop.permute.xlu1 %53 }
  0x95   :  { %vm58_vm11 = vcmp.eq.s32.totalorder %v54_v30, %v23_v36 }
  0x97   :  { %v26_v37 = vpop.permute.xlu0 %25 }
  0x98   :  { %v57_v31 = vpop.permute.xlu1 %56  ;;  %vm30_vm4 = vcmp.eq.s32.totalorder %v26_v37, %v23_v36 }
  0x99   :  { %vm40_vm8 = vmor %vm30_vm4, %vm38_vm3  ;;  %vm59_vm14 = vcmp.eq.s32.totalorder %v57_v31, %v23_v36 }
  0x9a   :  { %vm50_vm12 = vmor %vm40_vm8, %vm48_vm7 }
  0x9b   :  { %vm60_vm0 = vmor %vm50_vm12, %vm58_vm11 }
  0x9c   :  { %v67_v40 = vpop.permute.xlu0 %66  ;;  %vm61_vm1 = vmor %vm51_vm13, %vm59_vm14 }
  0x9d   :  { %v211_v21 = vpop.eup %210  ;;  %v64_v32 = vpop.permute.xlu1 %63  ;;  %vm69_vm2 = vcmp.eq.s32.totalorder %v67_v40, %v23_v36 }
  0x9e   :  { %134 = vadd.xlane.f32.xlu1 %v211_v21  ;;  %vm68_vm15 = vcmp.eq.s32.totalorder %v64_v32, %v23_v36  ;;  %vm71_vm5 = vmor %vm61_vm1, %vm69_vm2 }
  0x9f   :  { %vm70_vm3 = vmor %vm60_vm0, %vm68_vm15  ;;  %vm102_vm15 = vcmp.gt.s32.totalorder %v23_v36, 0 }
  0xa1   :  { %v213_v22 = vpop.eup %212  ;;  %v84_v42 = vpop.permute.xlu0 %83 }
  0xa2   :  { %136 = vadd.xlane.f32.xlu1 %v213_v22  ;;  %v74_v33 = vpop.permute.xlu1 %73  ;;  %vm88_vm8 = vcmp.eq.s32.totalorder %v84_v42, %v23_v36 }
  0xa3   :  { %vm78_vm4 = vcmp.eq.s32.totalorder %v74_v33, %v23_v36 }
  0xa4   :  { %vm80_vm7 = vmor %vm70_vm3, %vm78_vm4  ;;  %vm20_vm4 = vcmask 0  }
  0xa5   :  { %vm90_vm12 = vmor %vm80_vm7, %vm88_vm8  ;;  %21 = vst.msk [vmem:[#allocation2] sm:$0x1] %vm20_vm4, %v252_v12 }
  0xa6   :  { %v77_v35 = vpop.permute.xlu1 %76  ;;  %v97_v44 = vpop.permute.xlu0 %96 }
  0xa7   :  { %vm79_vm6 = vcmp.eq.s32.totalorder %v77_v35, %v23_v36  ;;  %vm99_vm0 = vcmp.eq.s32.totalorder %v97_v44, %v23_v36 }
  0xa8   :  { %vm81_vm10 = vmor %vm71_vm5, %vm79_vm6 }
  0xab   :  { %v87_v38 = vpop.permute.xlu1 %86 }
  0xac   :  { %vm89_vm11 = vcmp.eq.s32.totalorder %v87_v38, %v23_v36  ;;  %v163_v5 = vld [vmem:[#allocation2] sm:$0x1] }
  0xad   :  { %vm91_vm14 = vmor %vm81_vm10, %vm89_vm11 }
  0xae   :  { %vm101_vm2 = vmor %vm91_vm14, %vm99_vm0 }
  0xaf   :  { %vm104_vm3 = vmand %vm101_vm2, %vm102_vm15 }
  0xb3   :  { %93 = vperm.xlu1 %208, %v12_v4  }
  0xd3   :  { %v115_v53 = vpop.xlane.xlu0 %114 }
  0xd4   :  { %vm117_vm5 = vcmp.gt.f32.partialorder %v115_v53, 0.0 }
  0xd7   :  { %111 = vadd.xlane.f32.xlu1 %v110_v24 }
 0x127   :  { %v135_v39 = vpop.xlane.xlu1 %134 }
 0x128   :  { %214 = vlog2.f32 %v135_v39 }
 0x12b   :  { %v137_v41 = vpop.xlane.xlu1 %136 }
 0x12c   :  { %216 = vlog2.f32 %v137_v41 }
 0x12d   :  { %218 = vrcp.f32 %v115_v53 }
 0x12f   :  { %v94_v43 = vpop.permute.xlu1 %93 }
 0x130   :  { %vm98_vm9 = vcmp.eq.s32.totalorder %v94_v43, %v23_v36 }
 0x131   :  { %vm100_vm13 = vmor %vm90_vm12, %vm98_vm9 }
 0x132   :  { %vm103_vm1 = vmand %vm100_vm13, %vm102_vm15 }
 0x135   :  { %v215_v45 = vpop.eup %214 }
 0x136   :  { %v139_v46 = vmul.f32 0.6931472, %v215_v45 }
 0x138   :  { %v142_v47 = vsub.f32 %v139_v46, %v283_v16 }
 0x139   :  { %v217_v48 = vpop.eup %216 }
 0x13a   :  { %v141_v49 = vmul.f32 0.6931472, %v217_v48  ;;  %v144_v50 = vsel %vm103_vm1, %v142_v47, 0.0  ;;  %v219_v55 = vpop.eup %218 }
 0x13b   :  { %146 = vadd.xlane.f32.xlu1 %v144_v50  ;;  %v123_v59 = vsel %vm117_vm5, %v219_v55, 0.0 }
 0x13c   :  { %v143_v51 = vsub.f32 %v141_v49, %v286_v19 }
 0x13e   :  { %v145_v52 = vsel %vm104_vm3, %v143_v51, 0.0 }
 0x13f   :  { %148 = vadd.xlane.f32.xlu0 %v145_v52 }
 0x160   :  { %v112_v54 = vpop.xlane.xlu1 %111 }
 0x161   :  { %220 = vrcp.f32 %v112_v54  ;;  %vm116_vm6 = vcmp.gt.f32.partialorder %v112_v54, 0.0 }
 0x16e   :  { %v221_v56 = vpop.eup %220 }
 0x16f   :  { %v122_v58 = vsel %vm116_vm6, %v221_v56, 0.0 }
 0x1c4   :  { %v147_v57 = vpop.xlane.xlu1 %146 }
 0x1c5   :  { %v150_v61 = vmul.f32 %v147_v57, %v122_v58 }
 0x1c8   :  { %v149_v60 = vpop.xlane.xlu0 %148 }
 0x1c9   :  { %v151_v62 = vmul.f32 %v149_v60, %v123_v59 }
 0x1cb   :  { %v164_v63 = vadd.f32 %v151_v62, %v150_v61 }
 0x1cd   :  { %v165_v0 = vrot.slane %v164_v63, 4 }
 0x1cf   :  { %v166_v1 = vadd.f32 %v165_v0, %v164_v63 }
 0x1d1   :  { %v167_v2 = vrot.slane %v166_v1, 2 }
 0x1d3   :  { %v168_v3 = vadd.f32 %v167_v2, %v166_v1 }
 0x1d5   :  { %v169_v4 = vrot.slane %v168_v3, 1 }
 0x1d7   :  { %v170_v6 = vadd.f32 %v169_v4, %v168_v3 }
 0x1d9   :  { %v171_v7 = vadd.f32 %v170_v6, %v163_v5 }
 0x1db   :  { %173 = vst.msk [vmem:[#allocation2] sm:$0x1] %vm20_vm4, %v171_v7 }
 0x1dc   :  { %233 = shalt.err (!%p230_p4)
}
 0x1dd   :  { %183 = dma.vmem_to_hbm [thread:$0]  %s181_s1, 16, %s301_s2, [#allocation3]  }
 0x1de   :  { %242 = dma.done.wait [#allocation3], 16  }
 0x1df   :  { %243 = vsyncadd [#allocation3], 4294967280 }
 0x1e0   :  { %187 = vsyncpa [#allocation3], 1 }

</bundles_post_ra>
